<compile_context>
chip_gen: v5e
topology: v5e:2x2
jax: 0.10.0
libtpu: 0.0.40
codegen_flags: <defaults>
</compile_context>

<pallas_src>
import functools

import jax
import jax.numpy as jnp
from jax.experimental import pallas as pl
from jax.experimental.pallas import tpu as pltpu

EPS = 1e-5
_PADL = 8  # sublane-aligned column offset of the interior inside the padded scratch
_VMEM_LIMIT = 64 * 1024 * 1024


# ---------------------------------------------------------------------------
# In-kernel helpers
# ---------------------------------------------------------------------------
def _bn_relu(x_f32, scale_ref, shift_ref):
    """y = max(x*scale + shift, 0) with per-channel scale/shift (refs are (1,C))."""
    C = x_f32.shape[-1]
    return jnp.maximum(
        x_f32 * scale_ref[...].reshape(1, 1, C) + shift_ref[...].reshape(1, 1, C),
        0.0)


def _fill_padded(a_pad, a):
    """Write `a` (H,W,C) into the padded VMEM scratch.

    Layout: rows [1, H+1) hold the interior, row 0 / row H+1 are the vertical
    halo; columns [_PADL, _PADL+W) hold the interior (sublane-aligned store),
    columns _PADL-1 and _PADL+W are the horizontal halo.  Only the halo is
    zeroed (every step -> megacore-safe), the interior is fully overwritten.
    """
    H, W, C = a.shape
    Wp = a_pad.shape[1]
    dt = a_pad.dtype
    zrow = jnp.zeros((1, Wp, C), dt)
    a_pad[0:1, :, :] = zrow                                   # top halo row
    a_pad[H + 1:H + 2, :, :] = zrow                           # bottom halo row
    zcol = jnp.zeros((H + 2, 1, C), dt)
    a_pad[:, _PADL - 1:_PADL, :] = zcol                       # left halo column
    a_pad[:, _PADL + W:_PADL + W + 1, :] = zcol               # right halo column
    a_pad[1:H + 1, _PADL:_PADL + W, :] = a.astype(dt)         # aligned interior store


def _conv_taps(a_pad, Ho, Wo, C, stride):
    """The nine shifted (and possibly strided) windows, each (Ho*Wo, C)."""
    taps = []
    for kh in range(3):
        for kw in range(3):
            c0 = _PADL - 1 + kw
            if stride == 1:
                t = a_pad[kh:kh + Ho, c0:c0 + Wo, :]
            else:
                t = a_pad[pl.ds(kh, Ho, stride), pl.ds(c0, Wo, stride), :]
            taps.append(t.reshape(Ho * Wo, C))
    return taps


def _conv3x3_deep(taps, w_ref):
    """3x3 conv as ONE deep matmul: K = 9*Cin (fills the MXU systolic depth)."""
    patch = jnp.concatenate(taps, axis=-1)                    # (Ho*Wo, 9*Cin)
    return jnp.dot(patch, w_ref[...], preferred_element_type=jnp.float32)


# ---------------------------------------------------------------------------
# Kernel 1: bn1 batch statistics — per-tile partial (sum, sum-of-squares).
#   Fully parallel grid (megacore friendly); tiny finalize happens in jnp.
# ---------------------------------------------------------------------------
def _bn_partial_kernel(x_ref, s_ref, sq_ref):
    x = x_ref[...].astype(jnp.float32)
    s_ref[...] = jnp.sum(x, axis=0, keepdims=True)
    sq_ref[...] = jnp.sum(x * x, axis=0, keepdims=True)


def _finalize_scale_shift(s_parts, sq_parts, gamma, beta, count):
    """Fold batch stats into y = x*scale + shift (torch BN training semantics)."""
    mean = jnp.sum(s_parts, axis=0) / count
    ex2 = jnp.sum(sq_parts, axis=0) / count
    var = ex2 - mean * mean                                   # biased variance
    scale = gamma.astype(jnp.float32) * jax.lax.rsqrt(var + EPS)
    shift = beta.astype(jnp.float32) - mean * scale
    return scale.reshape(1, -1), shift.reshape(1, -1)


def bn_scale_shift(x2d, gamma, beta):
    M, C = x2d.shape
    tm = min(1024, M)
    tm = max(8, (tm // 8) * 8)                                # sublane-aligned tile
    m_pad = pl.cdiv(M, tm) * tm
    if m_pad != M:
        # zero rows are exact no-ops for sum / sum-of-squares
        x2d = jnp.pad(x2d, ((0, m_pad - M), (0, 0)))
    nt = m_pad // tm
    s, sq = pl.pallas_call(
        _bn_partial_kernel,
        out_shape=(jax.ShapeDtypeStruct((nt, 1, C), jnp.float32),
                   jax.ShapeDtypeStruct((nt, 1, C), jnp.float32)),
        grid=(nt,),
        in_specs=[pl.BlockSpec((tm, C), lambda i: (i, 0))],
        out_specs=(pl.BlockSpec((None, 1, C), lambda i: (i, 0, 0)),
                   pl.BlockSpec((None, 1, C), lambda i: (i, 0, 0))),
        compiler_params=pltpu.CompilerParams(
            dimension_semantics=("parallel",),
            vmem_limit_bytes=_VMEM_LIMIT),
    )(x2d)
    return _finalize_scale_shift(s.reshape(nt, C), sq.reshape(nt, C),
                                 gamma, beta, float(M))


# ---------------------------------------------------------------------------
# Kernel 2: fused  relu(bn1(x)) -> conv1 (3x3, stride)  [+ 1x1 shortcut]
#           + per-image bn2 partial statistics of c1 (no c1 re-read later).
# ---------------------------------------------------------------------------
def _k2_proj_kernel(x_ref, scale_ref, shift_ref, w_ref, wsc_ref,
                    c1_ref, sc_ref, s_ref, sq_ref, a_pad, *, stride):
    H, W, Cin = x_ref.shape
    Ho, Wo, Cout = c1_ref.shape
    Csc = sc_ref.shape[-1]

    a = _bn_relu(x_ref[...].astype(jnp.float32), scale_ref, shift_ref)
    _fill_padded(a_pad, a)
    taps = _conv_taps(a_pad, Ho, Wo, Cin, stride)

    # 1x1 strided projection shortcut reuses the resident center tap; issued
    # before the big matmul so it overlaps with patch assembly.
    sc = jnp.dot(taps[4], wsc_ref[...], preferred_element_type=jnp.float32)
    sc_ref[...] = sc.reshape(Ho, Wo, Csc).astype(sc_ref.dtype)

    acc = _conv3x3_deep(taps, w_ref)                          # (Ho*Wo, Cout) f32
    c1_ref[...] = acc.reshape(Ho, Wo, Cout).astype(c1_ref.dtype)

    # bn2 partial stats of this image's c1 tile (fused -> no HBM re-read of c1).
    s_ref[...] = jnp.sum(acc, axis=0, keepdims=True)
    sq_ref[...] = jnp.sum(acc * acc, axis=0, keepdims=True)


def _k2_id_kernel(x_ref, scale_ref, shift_ref, w_ref,
                  c1_ref, s_ref, sq_ref, a_pad, *, stride):
    H, W, Cin = x_ref.shape
    Ho, Wo, Cout = c1_ref.shape

    a = _bn_relu(x_ref[...].astype(jnp.float32), scale_ref, shift_ref)
    _fill_padded(a_pad, a)
    taps = _conv_taps(a_pad, Ho, Wo, Cin, stride)

    acc = _conv3x3_deep(taps, w_ref)
    c1_ref[...] = acc.reshape(Ho, Wo, Cout).astype(c1_ref.dtype)

    s_ref[...] = jnp.sum(acc, axis=0, keepdims=True)
    sq_ref[...] = jnp.sum(acc * acc, axis=0, keepdims=True)


# ---------------------------------------------------------------------------
# Kernel 3: fused  relu(bn2(c1)) -> conv2 (3x3, stride 1)  + residual add.
#   Projection variant: residual tile (sc) seeds the accumulator.
#   Identity  variant: residual = relu(bn1(x)) recomputed in-kernel from the
#                      raw input (no shortcut tensor ever touches HBM; exact
#                      even in the bf16 compute path).
# ---------------------------------------------------------------------------
def _k3_proj_kernel(x_ref, scale_ref, shift_ref, w_ref, res_ref, out_ref, a_pad):
    H, W, C = x_ref.shape
    Ho, Wo, Cout = out_ref.shape

    a = _bn_relu(x_ref[...].astype(jnp.float32), scale_ref, shift_ref)
    _fill_padded(a_pad, a)
    taps = _conv_taps(a_pad, Ho, Wo, C, 1)

    acc = res_ref[...].astype(jnp.float32).reshape(Ho * Wo, Cout)
    acc = acc + _conv3x3_deep(taps, w_ref)
    out_ref[...] = acc.reshape(Ho, Wo, Cout).astype(out_ref.dtype)


def _k3_id_kernel(x_ref, scale_ref, shift_ref, w_ref,
                  xin_ref, rscale_ref, rshift_ref, out_ref, a_pad):
    H, W, C = x_ref.shape
    Ho, Wo, Cout = out_ref.shape

    a = _bn_relu(x_ref[...].astype(jnp.float32), scale_ref, shift_ref)
    _fill_padded(a_pad, a)
    taps = _conv_taps(a_pad, Ho, Wo, C, 1)

    res = _bn_relu(xin_ref[...].astype(jnp.float32), rscale_ref, rshift_ref)
    acc = res.reshape(Ho * Wo, Cout)
    acc = acc + _conv3x3_deep(taps, w_ref)
    out_ref[...] = acc.reshape(Ho, Wo, Cout).astype(out_ref.dtype)


# ---------------------------------------------------------------------------
# Host-side weight re-layout (pure data movement)
# ---------------------------------------------------------------------------
def _conv3x3_w_to_kmat(w_oihw, dtype):
    # (Cout, Cin, 3, 3) -> (kh, kw, Cin, Cout) -> (9*Cin, Cout)
    # Row ordering (kh, kw, cin) matches the tap-concatenation column order.
    cout, cin = w_oihw.shape[0], w_oihw.shape[1]
    return jnp.transpose(w_oihw, (2, 3, 1, 0)).reshape(9 * cin, cout).astype(dtype)


# ---------------------------------------------------------------------------
# PreActBlock forward (input/output in NCHW, matching PyTorch)
# ---------------------------------------------------------------------------
def preact_block_forward(x_nchw, params, stride, compute_dtype=jnp.float32):
    x = jnp.transpose(x_nchw, (0, 2, 3, 1))                  # NCHW -> NHWC
    N, H, W, Cin = x.shape
    Cout = params["conv1_w"].shape[0]
    Ho = (H - 1) // stride + 1
    Wo = (W - 1) // stride + 1
    has_sc = (stride != 1) or (Cin != Cout)

    cparams = pltpu.CompilerParams(dimension_semantics=("parallel",),
                                   vmem_limit_bytes=_VMEM_LIMIT)

    # bn1 batch statistics -> per-channel (scale, shift)
    scale1, shift1 = bn_scale_shift(
        x.reshape(N * H * W, Cin), params["bn1_gamma"], params["bn1_beta"])

    w1 = _conv3x3_w_to_kmat(params["conv1_w"], compute_dtype)
    pad_scr1 = pltpu.VMEM((H + 2, _PADL + W + 1, Cin), compute_dtype)

    if has_sc:
        wsc = params["shortcut_w"].reshape(Cout, Cin).T.astype(compute_dtype)
        c1, sc, s2p, sq2p = pl.pallas_call(
            functools.partial(_k2_proj_kernel, stride=stride),
            out_shape=(jax.ShapeDtypeStruct((N, Ho, Wo, Cout), x.dtype),
                       jax.ShapeDtypeStruct((N, Ho, Wo, Cout), x.dtype),
                       jax.ShapeDtypeStruct((N, 1, Cout), jnp.float32),
                       jax.ShapeDtypeStruct((N, 1, Cout), jnp.float32)),
            grid=(N,),
            in_specs=[
                pl.BlockSpec((None, H, W, Cin), lambda n: (n, 0, 0, 0)),
                pl.BlockSpec((1, Cin), lambda n: (0, 0)),
                pl.BlockSpec((1, Cin), lambda n: (0, 0)),
                pl.BlockSpec((9 * Cin, Cout), lambda n: (0, 0)),
                pl.BlockSpec((Cin, Cout), lambda n: (0, 0)),
            ],
            out_specs=(pl.BlockSpec((None, Ho, Wo, Cout), lambda n: (n, 0, 0, 0)),
                       pl.BlockSpec((None, Ho, Wo, Cout), lambda n: (n, 0, 0, 0)),
                       pl.BlockSpec((None, 1, Cout), lambda n: (n, 0, 0)),
                       pl.BlockSpec((None, 1, Cout), lambda n: (n, 0, 0))),
            scratch_shapes=[pad_scr1],
            compiler_params=cparams,
        )(x, scale1, shift1, w1, wsc)
    else:
        c1, s2p, sq2p = pl.pallas_call(
            functools.partial(_k2_id_kernel, stride=stride),
            out_shape=(jax.ShapeDtypeStruct((N, Ho, Wo, Cout), x.dtype),
                       jax.ShapeDtypeStruct((N, 1, Cout), jnp.float32),
                       jax.ShapeDtypeStruct((N, 1, Cout), jnp.float32)),
            grid=(N,),
            in_specs=[
                pl.BlockSpec((None, H, W, Cin), lambda n: (n, 0, 0, 0)),
                pl.BlockSpec((1, Cin), lambda n: (0, 0)),
                pl.BlockSpec((1, Cin), lambda n: (0, 0)),
                pl.BlockSpec((9 * Cin, Cout), lambda n: (0, 0)),
            ],
            out_specs=(pl.BlockSpec((None, Ho, Wo, Cout), lambda n: (n, 0, 0, 0)),
                       pl.BlockSpec((None, 1, Cout), lambda n: (n, 0, 0)),
                       pl.BlockSpec((None, 1, Cout), lambda n: (n, 0, 0))),
            scratch_shapes=[pad_scr1],
            compiler_params=cparams,
        )(x, scale1, shift1, w1)

    # bn2 scale/shift from the fused partial statistics (tiny jnp reduce).
    scale2, shift2 = _finalize_scale_shift(
        s2p.reshape(N, Cout), sq2p.reshape(N, Cout),
        params["bn2_gamma"], params["bn2_beta"], float(N * Ho * Wo))

    w2 = _conv3x3_w_to_kmat(params["conv2_w"], compute_dtype)
    pad_scr2 = pltpu.VMEM((Ho + 2, _PADL + Wo + 1, Cout), compute_dtype)

    if has_sc:
        out = pl.pallas_call(
            _k3_proj_kernel,
            out_shape=jax.ShapeDtypeStruct((N, Ho, Wo, Cout), x.dtype),
            grid=(N,),
            in_specs=[
                pl.BlockSpec((None, Ho, Wo, Cout), lambda n: (n, 0, 0, 0)),
                pl.BlockSpec((1, Cout), lambda n: (0, 0)),
                pl.BlockSpec((1, Cout), lambda n: (0, 0)),
                pl.BlockSpec((9 * Cout, Cout), lambda n: (0, 0)),
                pl.BlockSpec((None, Ho, Wo, Cout), lambda n: (n, 0, 0, 0)),
            ],
            out_specs=pl.BlockSpec((None, Ho, Wo, Cout), lambda n: (n, 0, 0, 0)),
            scratch_shapes=[pad_scr2],
            compiler_params=cparams,
        )(c1, scale2, shift2, w2, sc)
    else:
        out = pl.pallas_call(
            _k3_id_kernel,
            out_shape=jax.ShapeDtypeStruct((N, Ho, Wo, Cout), x.dtype),
            grid=(N,),
            in_specs=[
                pl.BlockSpec((None, Ho, Wo, Cout), lambda n: (n, 0, 0, 0)),
                pl.BlockSpec((1, Cout), lambda n: (0, 0)),
                pl.BlockSpec((1, Cout), lambda n: (0, 0)),
                pl.BlockSpec((9 * Cout, Cout), lambda n: (0, 0)),
                pl.BlockSpec((None, H, W, Cin), lambda n: (n, 0, 0, 0)),
                pl.BlockSpec((1, Cin), lambda n: (0, 0)),
                pl.BlockSpec((1, Cin), lambda n: (0, 0)),
            ],
            out_specs=pl.BlockSpec((None, Ho, Wo, Cout), lambda n: (n, 0, 0, 0)),
            scratch_shapes=[pad_scr2],
            compiler_params=cparams,
        )(c1, scale2, shift2, w2, x, scale1, shift1)

    return jnp.transpose(out, (0, 3, 1, 2))                  # NHWC -> NCHW


# ---------------------------------------------------------------------------
# Pure-JAX reference (exact semantics of the PyTorch module in training mode)
# ---------------------------------------------------------------------------
def ref_forward(x, params, stride):
    def bn(z, g, b):
        mean = z.mean(axis=(0, 2, 3), keepdims=True)
        var = ((z - mean) ** 2).mean(axis=(0, 2, 3), keepdims=True)
        return ((z - mean) / jnp.sqrt(var + EPS)
                * g.reshape(1, -1, 1, 1) + b.reshape(1, -1, 1, 1))

    def conv(z, w, s, p):
        return jax.lax.conv_general_dilated(
            z, w, (s, s), [(p, p), (p, p)],
            dimension_numbers=("NCHW", "OIHW", "NCHW"))

    Cin = x.shape[1]
    Cout = params["conv1_w"].shape[0]
    out = jax.nn.relu(bn(x, params["bn1_gamma"], params["bn1_beta"]))
    if stride != 1 or Cin != Cout:
        sc = conv(out, params["shortcut_w"], stride, 0)
    else:
        sc = out
    out = conv(out, params["conv1_w"], stride, 1)
    out = conv(jax.nn.relu(bn(out, params["bn2_gamma"], params["bn2_beta"])),
               params["conv2_w"], 1, 1)
    return out + sc


if __name__ == "__main__":
    key = jax.random.PRNGKey(0)
    k_x, k_c1, k_c2, k_sc, k_g1, k_b1, k_g2, k_b2 = jax.random.split(key, 8)

    # ---- Config 1: stride=2 with 1x1-conv shortcut (projection path) ----
    N, in_planes, planes, H, W, stride = 2, 4, 8, 16, 16, 2
    x = jax.random.normal(k_x, (N, in_planes, H, W), dtype=jnp.float32)
    params = {
        "bn1_gamma": 1.0 + 0.1 * jax.random.normal(k_g1, (in_planes,), jnp.float32),
        "bn1_beta": 0.1 * jax.random.normal(k_b1, (in_planes,), jnp.float32),
        "conv1_w": 0.1 * jax.random.normal(k_c1, (planes, in_planes, 3, 3), jnp.float32),
        "bn2_gamma": 1.0 + 0.1 * jax.random.normal(k_g2, (planes,), jnp.float32),
        "bn2_beta": 0.1 * jax.random.normal(k_b2, (planes,), jnp.float32),
        "conv2_w": 0.1 * jax.random.normal(k_c2, (planes, planes, 3, 3), jnp.float32),
        "shortcut_w": 0.1 * jax.random.normal(k_sc, (planes, in_planes, 1, 1), jnp.float32),
    }

    out = jax.block_until_ready(preact_block_forward(x, params, stride))
    ref = jax.block_until_ready(ref_forward(x, params, stride))
    assert out.shape == (N, planes, H // stride, W // stride)
    err = float(jnp.max(jnp.abs(out - ref)))
    assert jnp.allclose(out, ref, atol=1e-3, rtol=1e-3), err

    # bf16 MXU path (f32 accumulation) — loose tolerance sanity check.
    out_bf16 = jax.block_until_ready(
        preact_block_forward(x, params, stride, compute_dtype=jnp.bfloat16))
    assert float(jnp.max(jnp.abs(out_bf16 - ref))) < 0.2

    # ---- Config 2: stride=1 identity shortcut (in_planes == planes) ----
    kk = jax.random.split(jax.random.PRNGKey(1), 7)
    N2, planes2, H2, W2, stride2 = 2, 8, 16, 16, 1
    x2 = jax.random.normal(kk[0], (N2, planes2, H2, W2), dtype=jnp.float32)
    params2 = {
        "bn1_gamma": 1.0 + 0.1 * jax.random.normal(kk[1], (planes2,), jnp.float32),
        "bn1_beta": 0.1 * jax.random.normal(kk[2], (planes2,), jnp.float32),
        "conv1_w": 0.1 * jax.random.normal(kk[3], (planes2, planes2, 3, 3), jnp.float32),
        "bn2_gamma": 1.0 + 0.1 * jax.random.normal(kk[4], (planes2,), jnp.float32),
        "bn2_beta": 0.1 * jax.random.normal(kk[5], (planes2,), jnp.float32),
        "conv2_w": 0.1 * jax.random.normal(kk[6], (planes2, planes2, 3, 3), jnp.float32),
    }
    out2 = jax.block_until_ready(preact_block_forward(x2, params2, stride2))
    ref2 = jax.block_until_ready(ref_forward(x2, params2, stride2))
    assert out2.shape == (N2, planes2, H2, W2)
    err2 = float(jnp.max(jnp.abs(out2 - ref2)))
    assert jnp.allclose(out2, ref2, atol=1e-3, rtol=1e-3), err2

    print("KERNEL_OK")
</pallas_src>

<mosaic_0001>
module attributes {stable_mosaic.version = 11 : i64} {
  func.func @_bn_partial_kernel(%arg0: i32, %arg1: memref<512x4xf32, #tpu.memory_space<vmem>>, %arg2: memref<1x1x4xf32, #tpu.memory_space<vmem>>, %arg3: memref<1x1x4xf32, #tpu.memory_space<vmem>>) attributes {dimension_semantics = [#tpu.dimension_semantics<parallel>], iteration_bounds = array<i64: 1>, scalar_prefetch = 0 : i64, scratch_operands = 0 : i64, tpu.core_type = #tpu.core_type<tc>, window_params = [{transform_indices = @transform_0, window_bounds = array<i64: 512, 4>}, {transform_indices = @transform_1, window_bounds = array<i64: 1, 1, 4>}, {transform_indices = @transform_2, window_bounds = array<i64: 1, 1, 4>}]} {
    %c0 = arith.constant 0 : index
    %c0_0 = arith.constant 0 : index
    %0 = vector.load %arg1[%c0, %c0_0] : memref<512x4xf32, #tpu.memory_space<vmem>>, vector<512x4xf32>
    %cst = arith.constant dense<0.000000e+00> : vector<4xf32>
    %1 = vector.multi_reduction <add>, %0, %cst [0] : vector<512x4xf32> to vector<4xf32>
    %2 = vector.shape_cast %1 : vector<4xf32> to vector<1x4xf32>
    %c0_1 = arith.constant 0 : index
    %c0_2 = arith.constant 0 : index
    %c0_3 = arith.constant 0 : index
    %3 = vector.load %arg2[%c0_1, %c0_2, %c0_3] : memref<1x1x4xf32, #tpu.memory_space<vmem>>, vector<1x1x4xf32>
    %4 = vector.shape_cast %3 : vector<1x1x4xf32> to vector<1x4xf32>
    %5 = vector.shape_cast %2 : vector<1x4xf32> to vector<1x1x4xf32>
    tpu.vector_store %arg2[%c0_1, %c0_2, %c0_3], %5 {strides = array<i32>} : memref<1x1x4xf32, #tpu.memory_space<vmem>>, vector<1x1x4xf32>,
    %6 = arith.mulf %0, %0 : vector<512x4xf32>
    %cst_4 = arith.constant dense<0.000000e+00> : vector<4xf32>
    %7 = vector.multi_reduction <add>, %6, %cst_4 [0] : vector<512x4xf32> to vector<4xf32>
    %8 = vector.shape_cast %7 : vector<4xf32> to vector<1x4xf32>
    %c0_5 = arith.constant 0 : index
    %c0_6 = arith.constant 0 : index
    %c0_7 = arith.constant 0 : index
    %9 = vector.load %arg3[%c0_5, %c0_6, %c0_7] : memref<1x1x4xf32, #tpu.memory_space<vmem>>, vector<1x1x4xf32>
    %10 = vector.shape_cast %9 : vector<1x1x4xf32> to vector<1x4xf32>
    %11 = vector.shape_cast %8 : vector<1x4xf32> to vector<1x1x4xf32>
    tpu.vector_store %arg3[%c0_5, %c0_6, %c0_7], %11 {strides = array<i32>} : memref<1x1x4xf32, #tpu.memory_space<vmem>>, vector<1x1x4xf32>,
    return
  }
  func.func @transform_0(%arg0: i32) -> (i32, i32) {
    %c0_i32 = arith.constant 0 : i32
    %c0_i32_0 = arith.constant 0 : i32
    return %arg0, %c0_i32 : i32, i32
  }
  func.func @transform_1(%arg0: i32) -> (i32, i32, i32) {
    %c0_i32 = arith.constant 0 : i32
    %c0_i32_0 = arith.constant 0 : i32
    %c0_i32_1 = arith.constant 0 : i32
    return %arg0, %c0_i32, %c0_i32_0 : i32, i32, i32
  }
  func.func @transform_2(%arg0: i32) -> (i32, i32, i32) {
    %c0_i32 = arith.constant 0 : i32
    %c0_i32_0 = arith.constant 0 : i32
    %c0_i32_1 = arith.constant 0 : i32
    return %arg0, %c0_i32, %c0_i32_0 : i32, i32, i32
  }
}

</mosaic_0001>

<bundles_post_ra>
// kernel: tpu_custom_call.1
= control target key start
LH: loop header
LB: loop body
LE: loop exit
PB: predicated region body
PF: predicated region fallthrough
CT: control target
= control target key end

     0   :  { %8 = vsyncpa [#allocation3], 0  ;;  %s841_s0 = inlined_call_operand.vmem [shape: f32[512,4], index: 0, kind: input, shape index: {}]   ;;  %s842_s1 = inlined_call_operand.hbm [shape: f32[1,1,4], index: 1, kind: output, shape index: {0}]   ;;  %s843_s2 = inlined_call_operand.hbm [shape: f32[1,1,4], index: 2, kind: output, shape index: {1}]  }
   0x1   :  { %9 = vsyncpa [#allocation5], 0  ;;  %v12_v0 = vld [vmem:[%s841_s0] sm:$0xff]  ;;  %v13_v1 = vld [vmem:[%s841_s0 + $0x8] sm:$0xff]  ;;  %vm76_vm0 = vcmask 31744   ;;  %s417_s28 = sshll.u32 %s842_s1, 4  ;;  %s418_s28 = int_to_ptr.hbm [resolvable:$true] %s417_s28 }
   0x2   :  { %v14_v2 = vld [vmem:[%s841_s0 + $0x10] sm:$0xff]  ;;  %v77_v3 = vsel %vm76_vm0, %v12_v0, 0.0  ;;  %v78_v4 = vsel %vm76_vm0, %v13_v1, 0.0  ;;  %v15_v5 = vld [vmem:[%s841_s0 + $0x18] sm:$0xff]  ;;  %v16_v9 = vld [vmem:[%s841_s0 + $0x20] sm:$0xff]  ;;  %v212_v21 = vmul.f32 %v12_v0, %v12_v0  ;;  %v213_v22 = vmul.f32 %v13_v1, %v13_v1  ;;  %s497_s29 = smov [#allocation4]  }
   0x3   :  { %v79_v6 = vadd.f32 %v78_v4, %v77_v3  ;;  %v80_v7 = vsel %vm76_vm0, %v14_v2, 0.0  ;;  %v82_v8 = vsel %vm76_vm0, %v15_v5, 0.0  ;;  %v84_v11 = vsel %vm76_vm0, %v16_v9, 0.0  ;;  %v17_v12 = vld [vmem:[%s841_s0 + $0x28] sm:$0xff]  ;;  %v18_v15 = vld [vmem:[%s841_s0 + $0x30] sm:$0xff]  ;;  %v19_v18 = vld [vmem:[%s841_s0 + $0x38] sm:$0xff] }
   0x4   :  { %v86_v14 = vsel %vm76_vm0, %v17_v12, 0.0  ;;  %v88_v17 = vsel %vm76_vm0, %v18_v15, 0.0  ;;  %v90_v20 = vsel %vm76_vm0, %v19_v18, 0.0  ;;  %v214_v23 = vmul.f32 %v14_v2, %v14_v2  ;;  %v20_v24 = vld [vmem:[%s841_s0 + $0x40] sm:$0xff]  ;;  %v21_v26 = vld [vmem:[%s841_s0 + $0x48] sm:$0xff]  ;;  %v22_v35 = vld [vmem:[%s841_s0 + $0x50] sm:$0xff] }
   0x5   :  { %v81_v10 = vadd.f32 %v80_v7, %v79_v6  ;;  %v92_v27 = vsel %vm76_vm0, %v20_v24, 0.0  ;;  %v215_v28 = vmul.f32 %v15_v5, %v15_v5  ;;  %v94_v30 = vsel %vm76_vm0, %v21_v26, 0.0  ;;  %v23_v41 = vld [vmem:[%s841_s0 + $0x58] sm:$0xff]  ;;  %v24_v47 = vld [vmem:[%s841_s0 + $0x60] sm:$0xff]  ;;  %v25_v53 = vld [vmem:[%s841_s0 + $0x68] sm:$0xff]  ;;  %s426_s30 = sshll.u32 %s497_s29, 4  ;;  %s427_s30 = int_to_ptr.vmem [resolvable:$true] %s426_s30 }
   0x6   :  { %v216_v31 = vmul.f32 %v16_v9, %v16_v9  ;;  %v276_v32 = vsel %vm76_vm0, %v212_v21, 0.0  ;;  %v277_v33 = vsel %vm76_vm0, %v213_v22, 0.0  ;;  %v279_v34 = vsel %vm76_vm0, %v214_v23, 0.0  ;;  %v26_v59 = vld [vmem:[%s841_s0 + $0x70] sm:$0xff]  ;;  %v27_v1 = vld [vmem:[%s841_s0 + $0x78] sm:$0xff]  ;;  %v28_v7 = vld [vmem:[%s841_s0 + $0x80] sm:$0xff] }
   0x7   :  { %v83_v13 = vadd.f32 %v82_v8, %v81_v10  ;;  %v278_v37 = vadd.f32 %v277_v33, %v276_v32  ;;  %v96_v38 = vsel %vm76_vm0, %v22_v35, 0.0  ;;  %v217_v39 = vmul.f32 %v17_v12, %v17_v12  ;;  %s428_s4 = sshll.u32 %s843_s2, 4  ;;  %s429_s4 = int_to_ptr.hbm [resolvable:$true] %s428_s4 }
   0x8   :  { %v281_v40 = vsel %vm76_vm0, %v215_v28, 0.0  ;;  %v98_v44 = vsel %vm76_vm0, %v23_v41, 0.0  ;;  %v218_v45 = vmul.f32 %v18_v15, %v18_v15  ;;  %v283_v46 = vsel %vm76_vm0, %v216_v31, 0.0  ;;  %v32_v31 = vld [vmem:[%s841_s0 + $0xa0] sm:$0xff] }
   0x9   :  { %v85_v16 = vadd.f32 %v84_v11, %v83_v13  ;;  %v280_v43 = vadd.f32 %v279_v34, %v278_v37  ;;  %v100_v50 = vsel %vm76_vm0, %v24_v47, 0.0  ;;  %v219_v51 = vmul.f32 %v19_v18, %v19_v18  ;;  %v29_v13 = vld [vmem:[%s841_s0 + $0x88] sm:$0xff] }
   0xa   :  { %v285_v52 = vsel %vm76_vm0, %v217_v39, 0.0  ;;  %v102_v56 = vsel %vm76_vm0, %v25_v53, 0.0  ;;  %v220_v57 = vmul.f32 %v20_v24, %v20_v24  ;;  %v287_v58 = vsel %vm76_vm0, %v218_v45, 0.0  ;;  %v33_v37 = vld [vmem:[%s841_s0 + $0xa8] sm:$0xff] }
   0xb   :  { %v87_v19 = vadd.f32 %v86_v14, %v85_v16  ;;  %v282_v49 = vadd.f32 %v281_v40, %v280_v43  ;;  %v104_v62 = vsel %vm76_vm0, %v26_v59, 0.0  ;;  %v221_v63 = vmul.f32 %v21_v26, %v21_v26  ;;  %v34_v43 = vld [vmem:[%s841_s0 + $0xb0] sm:$0xff] }
   0xc   :  { %v289_v0 = vsel %vm76_vm0, %v219_v51, 0.0  ;;  %v106_v4 = vsel %vm76_vm0, %v27_v1, 0.0  ;;  %v222_v5 = vmul.f32 %v22_v35, %v22_v35  ;;  %v291_v6 = vsel %vm76_vm0, %v220_v57, 0.0 }
   0xd   :  { %v89_v25 = vadd.f32 %v88_v17, %v87_v19  ;;  %v284_v55 = vadd.f32 %v283_v46, %v282_v49  ;;  %v108_v10 = vsel %vm76_vm0, %v28_v7, 0.0  ;;  %v223_v11 = vmul.f32 %v23_v41, %v23_v41  ;;  %v30_v19 = vld [vmem:[%s841_s0 + $0x90] sm:$0xff]  ;;  %v35_v49 = vld [vmem:[%s841_s0 + $0xb8] sm:$0xff] }
   0xe   :  { %v293_v12 = vsel %vm76_vm0, %v221_v63, 0.0  ;;  %v110_v16 = vsel %vm76_vm0, %v29_v13, 0.0  ;;  %v224_v17 = vmul.f32 %v24_v47, %v24_v47  ;;  %v295_v18 = vsel %vm76_vm0, %v222_v5, 0.0 }
   0xf   :  { %v91_v29 = vadd.f32 %v90_v20, %v89_v25  ;;  %v286_v61 = vadd.f32 %v285_v52, %v284_v55  ;;  %v112_v22 = vsel %vm76_vm0, %v30_v19, 0.0  ;;  %v225_v23 = vmul.f32 %v25_v53, %v25_v53  ;;  %v31_v25 = vld [vmem:[%s841_s0 + $0x98] sm:$0xff]  ;;  %v36_v55 = vld [vmem:[%s841_s0 + $0xc0] sm:$0xff] }
  0x10   :  { %v297_v24 = vsel %vm76_vm0, %v223_v11, 0.0  ;;  %v114_v28 = vsel %vm76_vm0, %v31_v25, 0.0  ;;  %v116_v34 = vsel %vm76_vm0, %v32_v31, 0.0  ;;  %v227_v35 = vmul.f32 %v27_v1, %v27_v1 }
  0x11   :  { %v93_v36 = vadd.f32 %v92_v27, %v91_v29  ;;  %v288_v3 = vadd.f32 %v287_v58, %v286_v61  ;;  %v226_v29 = vmul.f32 %v26_v59, %v26_v59  ;;  %v118_v40 = vsel %vm76_vm0, %v33_v37, 0.0  ;;  %v37_v61 = vld [vmem:[%s841_s0 + $0xc8] sm:$0xff] }
  0x12   :  { %v228_v41 = vmul.f32 %v28_v7, %v28_v7  ;;  %v120_v46 = vsel %vm76_vm0, %v34_v43, 0.0  ;;  %v229_v47 = vmul.f32 %v29_v13, %v29_v13  ;;  %v122_v52 = vsel %vm76_vm0, %v35_v49, 0.0 }
  0x13   :  { %v95_v42 = vadd.f32 %v94_v30, %v93_v36  ;;  %v290_v9 = vadd.f32 %v289_v0, %v288_v3  ;;  %v299_v30 = vsel %vm76_vm0, %v224_v17, 0.0  ;;  %v301_v36 = vsel %vm76_vm0, %v225_v23, 0.0  ;;  %v38_v3 = vld [vmem:[%s841_s0 + $0xd0] sm:$0xff] }
  0x14   :  { %v230_v53 = vmul.f32 %v30_v19, %v30_v19  ;;  %v124_v58 = vsel %vm76_vm0, %v36_v55, 0.0  ;;  %v231_v59 = vmul.f32 %v31_v25, %v31_v25  ;;  %v126_v0 = vsel %vm76_vm0, %v37_v61, 0.0 }
  0x15   :  { %v97_v48 = vadd.f32 %v96_v38, %v95_v42  ;;  %v292_v15 = vadd.f32 %v291_v6, %v290_v9  ;;  %v303_v42 = vsel %vm76_vm0, %v226_v29, 0.0  ;;  %v232_v1 = vmul.f32 %v32_v31, %v32_v31  ;;  %v39_v9 = vld [vmem:[%s841_s0 + $0xd8] sm:$0xff] }
  0x16   :  { %v128_v6 = vsel %vm76_vm0, %v38_v3, 0.0  ;;  %v233_v7 = vmul.f32 %v33_v37, %v33_v37  ;;  %v234_v13 = vmul.f32 %v34_v43, %v34_v43  ;;  %v235_v19 = vmul.f32 %v35_v49, %v35_v49 }
  0x17   :  { %v99_v54 = vadd.f32 %v98_v44, %v97_v48  ;;  %v294_v21 = vadd.f32 %v293_v12, %v292_v15  ;;  %v305_v48 = vsel %vm76_vm0, %v227_v35, 0.0  ;;  %v130_v12 = vsel %vm76_vm0, %v39_v9, 0.0  ;;  %v40_v15 = vld [vmem:[%s841_s0 + $0xe0] sm:$0xff] }
  0x18   :  { %v236_v25 = vmul.f32 %v36_v55, %v36_v55  ;;  %v237_v31 = vmul.f32 %v37_v61, %v37_v61  ;;  %v238_v37 = vmul.f32 %v38_v3, %v38_v3  ;;  %v239_v43 = vmul.f32 %v39_v9, %v39_v9 }
  0x19   :  { %v101_v60 = vadd.f32 %v100_v50, %v99_v54  ;;  %v296_v27 = vadd.f32 %v295_v18, %v294_v21  ;;  %v307_v54 = vsel %vm76_vm0, %v228_v41, 0.0  ;;  %v132_v18 = vsel %vm76_vm0, %v40_v15, 0.0  ;;  %v41_v21 = vld [vmem:[%s841_s0 + $0xe8] sm:$0xff] }
  0x1a   :  { %v240_v49 = vmul.f32 %v40_v15, %v40_v15  ;;  %v241_v55 = vmul.f32 %v41_v21, %v41_v21  ;;  %vm210_vm1 = vcmask 24576  }
  0x1b   :  { %v103_v2 = vadd.f32 %v102_v56, %v101_v60  ;;  %v298_v33 = vadd.f32 %v297_v24, %v296_v27  ;;  %v309_v60 = vsel %vm76_vm0, %v229_v47, 0.0  ;;  %v134_v24 = vsel %vm76_vm0, %v41_v21, 0.0  ;;  %v42_v27 = vld [vmem:[%s841_s0 + $0xf0] sm:$0xff] }
  0x1c   :  { %v242_v61 = vmul.f32 %v42_v27, %v42_v27 }
  0x1d   :  { %v105_v8 = vadd.f32 %v104_v62, %v103_v2  ;;  %v300_v39 = vadd.f32 %v299_v30, %v298_v33  ;;  %v311_v2 = vsel %vm76_vm0, %v230_v53, 0.0  ;;  %v136_v30 = vsel %vm76_vm0, %v42_v27, 0.0  ;;  %v43_v33 = vld [vmem:[%s841_s0 + $0xf8] sm:$0xff] }
  0x1e   :  { %v243_v3 = vmul.f32 %v43_v33, %v43_v33 }
  0x1f   :  { %v107_v14 = vadd.f32 %v106_v4, %v105_v8  ;;  %v302_v45 = vadd.f32 %v301_v36, %v300_v39  ;;  %v313_v8 = vsel %vm76_vm0, %v231_v59, 0.0  ;;  %v138_v36 = vsel %vm76_vm0, %v43_v33, 0.0  ;;  %v44_v39 = vld [vmem:[%s841_s0 + $0x100] sm:$0xff] }
  0x20   :  { %v244_v9 = vmul.f32 %v44_v39, %v44_v39 }
  0x21   :  { %v109_v20 = vadd.f32 %v108_v10, %v107_v14  ;;  %v304_v51 = vadd.f32 %v303_v42, %v302_v45  ;;  %v315_v14 = vsel %vm76_vm0, %v232_v1, 0.0  ;;  %v140_v42 = vsel %vm76_vm0, %v44_v39, 0.0  ;;  %v45_v45 = vld [vmem:[%s841_s0 + $0x108] sm:$0xff] }
  0x22   :  { %v245_v15 = vmul.f32 %v45_v45, %v45_v45 }
  0x23   :  { %v111_v26 = vadd.f32 %v110_v16, %v109_v20  ;;  %v306_v57 = vadd.f32 %v305_v48, %v304_v51  ;;  %v317_v20 = vsel %vm76_vm0, %v233_v7, 0.0  ;;  %v142_v48 = vsel %vm76_vm0, %v45_v45, 0.0  ;;  %v46_v51 = vld [vmem:[%s841_s0 + $0x110] sm:$0xff] }
  0x24   :  { %v246_v21 = vmul.f32 %v46_v51, %v46_v51 }
  0x25   :  { %v113_v32 = vadd.f32 %v112_v22, %v111_v26  ;;  %v308_v63 = vadd.f32 %v307_v54, %v306_v57  ;;  %v319_v26 = vsel %vm76_vm0, %v234_v13, 0.0  ;;  %v144_v54 = vsel %vm76_vm0, %v46_v51, 0.0  ;;  %v47_v57 = vld [vmem:[%s841_s0 + $0x118] sm:$0xff] }
  0x26   :  { %v247_v27 = vmul.f32 %v47_v57, %v47_v57 }
  0x27   :  { %v115_v38 = vadd.f32 %v114_v28, %v113_v32  ;;  %v310_v5 = vadd.f32 %v309_v60, %v308_v63  ;;  %v321_v32 = vsel %vm76_vm0, %v235_v19, 0.0  ;;  %v146_v60 = vsel %vm76_vm0, %v47_v57, 0.0  ;;  %v48_v63 = vld [vmem:[%s841_s0 + $0x120] sm:$0xff] }
  0x28   :  { %v248_v33 = vmul.f32 %v48_v63, %v48_v63 }
  0x29   :  { %v117_v44 = vadd.f32 %v116_v34, %v115_v38  ;;  %v312_v11 = vadd.f32 %v311_v2, %v310_v5  ;;  %v323_v38 = vsel %vm76_vm0, %v236_v25, 0.0  ;;  %v148_v2 = vsel %vm76_vm0, %v48_v63, 0.0  ;;  %v49_v5 = vld [vmem:[%s841_s0 + $0x128] sm:$0xff] }
  0x2a   :  { %v249_v39 = vmul.f32 %v49_v5, %v49_v5 }
  0x2b   :  { %v119_v50 = vadd.f32 %v118_v40, %v117_v44  ;;  %v314_v17 = vadd.f32 %v313_v8, %v312_v11  ;;  %v325_v44 = vsel %vm76_vm0, %v237_v31, 0.0  ;;  %v150_v8 = vsel %vm76_vm0, %v49_v5, 0.0  ;;  %v50_v11 = vld [vmem:[%s841_s0 + $0x130] sm:$0xff] }
  0x2c   :  { %v250_v45 = vmul.f32 %v50_v11, %v50_v11 }
  0x2d   :  { %v121_v56 = vadd.f32 %v120_v46, %v119_v50  ;;  %v316_v23 = vadd.f32 %v315_v14, %v314_v17  ;;  %v327_v50 = vsel %vm76_vm0, %v238_v37, 0.0  ;;  %v152_v14 = vsel %vm76_vm0, %v50_v11, 0.0  ;;  %v51_v17 = vld [vmem:[%s841_s0 + $0x138] sm:$0xff] }
  0x2e   :  { %v251_v51 = vmul.f32 %v51_v17, %v51_v17 }
  0x2f   :  { %v123_v62 = vadd.f32 %v122_v52, %v121_v56  ;;  %v318_v29 = vadd.f32 %v317_v20, %v316_v23  ;;  %v329_v56 = vsel %vm76_vm0, %v239_v43, 0.0  ;;  %v154_v20 = vsel %vm76_vm0, %v51_v17, 0.0  ;;  %v52_v23 = vld [vmem:[%s841_s0 + $0x140] sm:$0xff] }
  0x30   :  { %v252_v57 = vmul.f32 %v52_v23, %v52_v23 }
  0x31   :  { %v125_v4 = vadd.f32 %v124_v58, %v123_v62  ;;  %v320_v35 = vadd.f32 %v319_v26, %v318_v29  ;;  %v331_v62 = vsel %vm76_vm0, %v240_v49, 0.0  ;;  %v156_v26 = vsel %vm76_vm0, %v52_v23, 0.0  ;;  %v53_v29 = vld [vmem:[%s841_s0 + $0x148] sm:$0xff] }
  0x32   :  { %v253_v63 = vmul.f32 %v53_v29, %v53_v29 }
  0x33   :  { %v127_v10 = vadd.f32 %v126_v0, %v125_v4  ;;  %v322_v41 = vadd.f32 %v321_v32, %v320_v35  ;;  %v333_v4 = vsel %vm76_vm0, %v241_v55, 0.0  ;;  %v158_v32 = vsel %vm76_vm0, %v53_v29, 0.0  ;;  %v54_v35 = vld [vmem:[%s841_s0 + $0x150] sm:$0xff] }
  0x34   :  { %v254_v5 = vmul.f32 %v54_v35, %v54_v35 }
  0x35   :  { %v129_v16 = vadd.f32 %v128_v6, %v127_v10  ;;  %v324_v47 = vadd.f32 %v323_v38, %v322_v41  ;;  %v335_v10 = vsel %vm76_vm0, %v242_v61, 0.0  ;;  %v160_v38 = vsel %vm76_vm0, %v54_v35, 0.0  ;;  %v55_v41 = vld [vmem:[%s841_s0 + $0x158] sm:$0xff] }
  0x36   :  { %v255_v11 = vmul.f32 %v55_v41, %v55_v41 }
  0x37   :  { %v131_v22 = vadd.f32 %v130_v12, %v129_v16  ;;  %v326_v53 = vadd.f32 %v325_v44, %v324_v47  ;;  %v337_v16 = vsel %vm76_vm0, %v243_v3, 0.0  ;;  %v162_v44 = vsel %vm76_vm0, %v55_v41, 0.0  ;;  %v56_v47 = vld [vmem:[%s841_s0 + $0x160] sm:$0xff] }
  0x38   :  { %v256_v17 = vmul.f32 %v56_v47, %v56_v47 }
  0x39   :  { %v133_v28 = vadd.f32 %v132_v18, %v131_v22  ;;  %v328_v59 = vadd.f32 %v327_v50, %v326_v53  ;;  %v339_v22 = vsel %vm76_vm0, %v244_v9, 0.0  ;;  %v164_v50 = vsel %vm76_vm0, %v56_v47, 0.0  ;;  %v57_v53 = vld [vmem:[%s841_s0 + $0x168] sm:$0xff] }
  0x3a   :  { %v257_v23 = vmul.f32 %v57_v53, %v57_v53 }
  0x3b   :  { %v135_v34 = vadd.f32 %v134_v24, %v133_v28  ;;  %v330_v1 = vadd.f32 %v329_v56, %v328_v59  ;;  %v341_v28 = vsel %vm76_vm0, %v245_v15, 0.0  ;;  %v166_v56 = vsel %vm76_vm0, %v57_v53, 0.0  ;;  %v58_v59 = vld [vmem:[%s841_s0 + $0x170] sm:$0xff] }
  0x3c   :  { %v258_v29 = vmul.f32 %v58_v59, %v58_v59 }
  0x3d   :  { %v137_v40 = vadd.f32 %v136_v30, %v135_v34  ;;  %v332_v7 = vadd.f32 %v331_v62, %v330_v1  ;;  %v343_v34 = vsel %vm76_vm0, %v246_v21, 0.0  ;;  %v168_v62 = vsel %vm76_vm0, %v58_v59, 0.0  ;;  %v59_v1 = vld [vmem:[%s841_s0 + $0x178] sm:$0xff] }
  0x3e   :  { %v259_v35 = vmul.f32 %v59_v1, %v59_v1 }
  0x3f   :  { %v139_v46 = vadd.f32 %v138_v36, %v137_v40  ;;  %v334_v13 = vadd.f32 %v333_v4, %v332_v7  ;;  %v345_v40 = vsel %vm76_vm0, %v247_v27, 0.0  ;;  %v170_v4 = vsel %vm76_vm0, %v59_v1, 0.0  ;;  %v60_v7 = vld [vmem:[%s841_s0 + $0x180] sm:$0xff] }
  0x40   :  { %v260_v41 = vmul.f32 %v60_v7, %v60_v7 }
  0x41   :  { %v141_v52 = vadd.f32 %v140_v42, %v139_v46  ;;  %v336_v19 = vadd.f32 %v335_v10, %v334_v13  ;;  %v347_v46 = vsel %vm76_vm0, %v248_v33, 0.0  ;;  %v172_v10 = vsel %vm76_vm0, %v60_v7, 0.0  ;;  %v61_v13 = vld [vmem:[%s841_s0 + $0x188] sm:$0xff] }
  0x42   :  { %v261_v47 = vmul.f32 %v61_v13, %v61_v13 }
  0x43   :  { %v143_v58 = vadd.f32 %v142_v48, %v141_v52  ;;  %v338_v25 = vadd.f32 %v337_v16, %v336_v19  ;;  %v349_v52 = vsel %vm76_vm0, %v249_v39, 0.0  ;;  %v174_v16 = vsel %vm76_vm0, %v61_v13, 0.0  ;;  %v62_v19 = vld [vmem:[%s841_s0 + $0x190] sm:$0xff] }
  0x44   :  { %v262_v53 = vmul.f32 %v62_v19, %v62_v19 }
  0x45   :  { %v145_v0 = vadd.f32 %v144_v54, %v143_v58  ;;  %v340_v31 = vadd.f32 %v339_v22, %v338_v25  ;;  %v351_v58 = vsel %vm76_vm0, %v250_v45, 0.0  ;;  %v176_v22 = vsel %vm76_vm0, %v62_v19, 0.0  ;;  %v63_v25 = vld [vmem:[%s841_s0 + $0x198] sm:$0xff] }
  0x46   :  { %v263_v59 = vmul.f32 %v63_v25, %v63_v25 }
  0x47   :  { %v147_v6 = vadd.f32 %v146_v60, %v145_v0  ;;  %v342_v37 = vadd.f32 %v341_v28, %v340_v31  ;;  %v353_v0 = vsel %vm76_vm0, %v251_v51, 0.0  ;;  %v178_v28 = vsel %vm76_vm0, %v63_v25, 0.0  ;;  %v64_v31 = vld [vmem:[%s841_s0 + $0x1a0] sm:$0xff] }
  0x48   :  { %v264_v1 = vmul.f32 %v64_v31, %v64_v31 }
  0x49   :  { %v149_v12 = vadd.f32 %v148_v2, %v147_v6  ;;  %v344_v43 = vadd.f32 %v343_v34, %v342_v37  ;;  %v355_v6 = vsel %vm76_vm0, %v252_v57, 0.0  ;;  %v180_v34 = vsel %vm76_vm0, %v64_v31, 0.0  ;;  %v65_v37 = vld [vmem:[%s841_s0 + $0x1a8] sm:$0xff] }
  0x4a   :  { %v265_v7 = vmul.f32 %v65_v37, %v65_v37 }
  0x4b   :  { %v151_v18 = vadd.f32 %v150_v8, %v149_v12  ;;  %v346_v49 = vadd.f32 %v345_v40, %v344_v43  ;;  %v357_v12 = vsel %vm76_vm0, %v253_v63, 0.0  ;;  %v182_v40 = vsel %vm76_vm0, %v65_v37, 0.0  ;;  %v66_v43 = vld [vmem:[%s841_s0 + $0x1b0] sm:$0xff] }
  0x4c   :  { %v266_v13 = vmul.f32 %v66_v43, %v66_v43 }
  0x4d   :  { %v153_v24 = vadd.f32 %v152_v14, %v151_v18  ;;  %v348_v55 = vadd.f32 %v347_v46, %v346_v49  ;;  %v359_v18 = vsel %vm76_vm0, %v254_v5, 0.0  ;;  %v184_v46 = vsel %vm76_vm0, %v66_v43, 0.0  ;;  %v67_v49 = vld [vmem:[%s841_s0 + $0x1b8] sm:$0xff] }
  0x4e   :  { %v267_v19 = vmul.f32 %v67_v49, %v67_v49 }
  0x4f   :  { %v155_v30 = vadd.f32 %v154_v20, %v153_v24  ;;  %v350_v61 = vadd.f32 %v349_v52, %v348_v55  ;;  %v361_v24 = vsel %vm76_vm0, %v255_v11, 0.0  ;;  %v186_v52 = vsel %vm76_vm0, %v67_v49, 0.0  ;;  %v68_v55 = vld [vmem:[%s841_s0 + $0x1c0] sm:$0xff] }
  0x50   :  { %v268_v25 = vmul.f32 %v68_v55, %v68_v55 }
  0x51   :  { %v157_v36 = vadd.f32 %v156_v26, %v155_v30  ;;  %v352_v3 = vadd.f32 %v351_v58, %v350_v61  ;;  %v363_v30 = vsel %vm76_vm0, %v256_v17, 0.0  ;;  %v188_v58 = vsel %vm76_vm0, %v68_v55, 0.0  ;;  %v69_v61 = vld [vmem:[%s841_s0 + $0x1c8] sm:$0xff] }
  0x52   :  { %v269_v31 = vmul.f32 %v69_v61, %v69_v61 }
  0x53   :  { %v159_v42 = vadd.f32 %v158_v32, %v157_v36  ;;  %v354_v9 = vadd.f32 %v353_v0, %v352_v3  ;;  %v365_v36 = vsel %vm76_vm0, %v257_v23, 0.0  ;;  %v190_v0 = vsel %vm76_vm0, %v69_v61, 0.0  ;;  %v70_v3 = vld [vmem:[%s841_s0 + $0x1d0] sm:$0xff] }
  0x54   :  { %v270_v37 = vmul.f32 %v70_v3, %v70_v3 }
  0x55   :  { %v161_v48 = vadd.f32 %v160_v38, %v159_v42  ;;  %v356_v15 = vadd.f32 %v355_v6, %v354_v9  ;;  %v367_v42 = vsel %vm76_vm0, %v258_v29, 0.0  ;;  %v192_v6 = vsel %vm76_vm0, %v70_v3, 0.0  ;;  %v71_v9 = vld [vmem:[%s841_s0 + $0x1d8] sm:$0xff] }
  0x57   :  { %v163_v54 = vadd.f32 %v162_v44, %v161_v48  ;;  %v358_v21 = vadd.f32 %v357_v12, %v356_v15  ;;  %v369_v48 = vsel %vm76_vm0, %v259_v35, 0.0  ;;  %v194_v12 = vsel %vm76_vm0, %v71_v9, 0.0  ;;  %v72_v15 = vld [vmem:[%s841_s0 + $0x1e0] sm:$0xff] }
  0x59   :  { %v165_v60 = vadd.f32 %v164_v50, %v163_v54  ;;  %v360_v27 = vadd.f32 %v359_v18, %v358_v21  ;;  %v371_v54 = vsel %vm76_vm0, %v260_v41, 0.0  ;;  %v196_v18 = vsel %vm76_vm0, %v72_v15, 0.0  ;;  %v73_v21 = vld [vmem:[%s841_s0 + $0x1e8] sm:$0xff] }
  0x5a   :  { %v271_v41 = vmul.f32 %v71_v9, %v71_v9  ;;  %v273_v49 = vmul.f32 %v73_v21, %v73_v21 }
  0x5b   :  { %v167_v2 = vadd.f32 %v166_v56, %v165_v60  ;;  %v362_v33 = vadd.f32 %v361_v24, %v360_v27  ;;  %v373_v60 = vsel %vm76_vm0, %v261_v47, 0.0  ;;  %v198_v24 = vsel %vm76_vm0, %v73_v21, 0.0  ;;  %v74_v27 = vld [vmem:[%s841_s0 + $0x1f0] sm:$0xff] }
  0x5d   :  { %v169_v8 = vadd.f32 %v168_v62, %v167_v2  ;;  %v364_v39 = vadd.f32 %v363_v30, %v362_v33  ;;  %v375_v2 = vsel %vm76_vm0, %v262_v53, 0.0  ;;  %v200_v30 = vsel %vm76_vm0, %v74_v27, 0.0  ;;  %v75_v33 = vld [vmem:[%s841_s0 + $0x1f8] sm:$0xff]  ;;  %s496_s0 = smov [#allocation2]  }
  0x5e   :  { %v274_v53 = vmul.f32 %v74_v27, %v74_v27  ;;  %s415_s25 = sshll.u32 %s496_s0, 4  ;;  %s416_s25 = int_to_ptr.vmem [resolvable:$true] %s415_s25 }
  0x5f   :  { %v171_v14 = vadd.f32 %v170_v4, %v169_v8  ;;  %v366_v45 = vadd.f32 %v365_v36, %v364_v39  ;;  %v377_v8 = vsel %vm76_vm0, %v263_v59, 0.0  ;;  %v202_v36 = vsel %vm76_vm0, %v75_v33, 0.0 }
  0x60   :  { %v399_v61 = vsel %vm76_vm0, %v274_v53, 0.0 }
  0x61   :  { %v173_v20 = vadd.f32 %v172_v10, %v171_v14  ;;  %v368_v51 = vadd.f32 %v367_v42, %v366_v45  ;;  %v379_v14 = vsel %vm76_vm0, %v264_v1, 0.0  ;;  %v389_v42 = vsel %vm76_vm0, %v269_v31, 0.0 }
  0x62   :  { %v272_v45 = vmul.f32 %v72_v15, %v72_v15 }
  0x63   :  { %v175_v26 = vadd.f32 %v174_v16, %v173_v20  ;;  %v370_v57 = vadd.f32 %v369_v48, %v368_v51  ;;  %v381_v20 = vsel %vm76_vm0, %v265_v7, 0.0 }
  0x65   :  { %v177_v32 = vadd.f32 %v176_v22, %v175_v26  ;;  %v372_v63 = vadd.f32 %v371_v54, %v370_v57  ;;  %v383_v26 = vsel %vm76_vm0, %v266_v13, 0.0  ;;  %v395_v54 = vsel %vm76_vm0, %v272_v45, 0.0 }
  0x66   :  { %v275_v57 = vmul.f32 %v75_v33, %v75_v33 }
  0x67   :  { %v179_v38 = vadd.f32 %v178_v28, %v177_v32  ;;  %v374_v5 = vadd.f32 %v373_v60, %v372_v63  ;;  %v385_v32 = vsel %vm76_vm0, %v267_v19, 0.0 }
  0x69   :  { %v181_v44 = vadd.f32 %v180_v34, %v179_v38  ;;  %v376_v11 = vadd.f32 %v375_v2, %v374_v5  ;;  %v387_v38 = vsel %vm76_vm0, %v268_v25, 0.0 }
  0x6b   :  { %v183_v50 = vadd.f32 %v182_v40, %v181_v44  ;;  %v378_v17 = vadd.f32 %v377_v8, %v376_v11 }
  0x6d   :  { %v185_v56 = vadd.f32 %v184_v46, %v183_v50  ;;  %v380_v23 = vadd.f32 %v379_v14, %v378_v17  ;;  %v391_v46 = vsel %vm76_vm0, %v270_v37, 0.0  ;;  %v393_v50 = vsel %vm76_vm0, %v271_v41, 0.0 }
  0x6f   :  { %v187_v62 = vadd.f32 %v186_v52, %v185_v56  ;;  %v382_v29 = vadd.f32 %v381_v20, %v380_v23 }
  0x71   :  { %v189_v4 = vadd.f32 %v188_v58, %v187_v62  ;;  %v384_v35 = vadd.f32 %v383_v26, %v382_v29  ;;  %v397_v58 = vsel %vm76_vm0, %v273_v49, 0.0 }
  0x73   :  { %v191_v10 = vadd.f32 %v190_v0, %v189_v4  ;;  %v386_v40 = vadd.f32 %v385_v32, %v384_v35  ;;  %v401_v0 = vsel %vm76_vm0, %v275_v57, 0.0 }
  0x75   :  { %v193_v16 = vadd.f32 %v192_v6, %v191_v10  ;;  %v388_v44 = vadd.f32 %v387_v38, %v386_v40 }
  0x77   :  { %v195_v22 = vadd.f32 %v194_v12, %v193_v16  ;;  %v390_v48 = vadd.f32 %v389_v42, %v388_v44 }
  0x79   :  { %v197_v28 = vadd.f32 %v196_v18, %v195_v22  ;;  %v392_v52 = vadd.f32 %v391_v46, %v390_v48 }
  0x7b   :  { %v199_v34 = vadd.f32 %v198_v24, %v197_v28  ;;  %v394_v56 = vadd.f32 %v393_v50, %v392_v52 }
  0x7d   :  { %v201_v39 = vadd.f32 %v200_v30, %v199_v34  ;;  %v396_v60 = vadd.f32 %v395_v54, %v394_v56 }
  0x7f   :  { %v203_v43 = vadd.f32 %v202_v36, %v201_v39  ;;  %v398_v63 = vadd.f32 %v397_v58, %v396_v60 }
  0x81   :  { %v204_v47 = vrot.slane %v203_v43, 4  ;;  %v400_v2 = vadd.f32 %v399_v61, %v398_v63 }
  0x83   :  { %v205_v51 = vadd.f32 %v204_v47, %v203_v43  ;;  %v402_v3 = vadd.f32 %v401_v0, %v400_v2 }
  0x85   :  { %v206_v55 = vrot.slane %v205_v51, 2  ;;  %v403_v4 = vrot.slane %v402_v3, 4 }
  0x87   :  { %v207_v59 = vadd.f32 %v206_v55, %v205_v51  ;;  %v404_v5 = vadd.f32 %v403_v4, %v402_v3 }
  0x89   :  { %v208_v62 = vrot.slane %v207_v59, 1  ;;  %v405_v6 = vrot.slane %v404_v5, 2 }
  0x8b   :  { %v209_v1 = vadd.f32 %v208_v62, %v207_v59  ;;  %v406_v7 = vadd.f32 %v405_v6, %v404_v5 }
  0x8d   :  { %211 = vst.msk [vmem:[#allocation2] sm:$0x1] %vm210_vm1, %v209_v1  ;;  %v407_v8 = vrot.slane %v406_v7, 1 }
  0x8e   :  { %420 = dma.vmem_to_hbm [thread:$0]  %s416_s25, 16, %s418_s28, [#allocation3]  }
  0x8f   :  { %v408_v9 = vadd.f32 %v407_v8, %v406_v7 }
  0x91   :  { %409 = vst.msk [vmem:[#allocation4] sm:$0x1] %vm210_vm1, %v408_v9 }
  0x92   :  { %431 = dma.vmem_to_hbm [thread:$0]  %s427_s30, 16, %s429_s4, [#allocation5]  }
  0x93   :  { %492 = dma.done.wait [#allocation3], 16  }
  0x94   :  { %493 = vsyncadd [#allocation3], 4294967280 }
  0x95   :  { %494 = dma.done.wait [#allocation5], 16  }
  0x96   :  { %495 = vsyncadd [#allocation5], 4294967280 }
  0x97   :  { %440 = vsyncpa [#allocation3], 1 }
  0x98   :  { %441 = vsyncpa [#allocation5], 1 }

</bundles_post_ra>
